<compile_context>
chip_gen: v7x
topology: tpu7x:2x2x1
jax: 0.10.0
libtpu: 0.0.40
codegen_flags: <defaults>
</compile_context>

<pallas_src>
import functools
import math

import jax
import jax.numpy as jnp
from jax.experimental import pallas as pl
from jax.experimental.pallas import tpu as pltpu


def critic_kernel(sa_ref, w1_ref, w2_ref, small_ref, out_ref, *,
                  state_dim, h1, h2):
    sa = sa_ref[...]                       # (B, state_dim + actions_dim)
    state = sa[:, :state_dim]
    action = sa[:, state_dim:]

    small = small_ref[...]                 # (8, 128) packed small params (one vreg)
    b1 = small[0:1, :h1]
    gamma = small[1:2, :h1]
    beta = small[2:3, :h1]
    b2 = small[3:4, :h2]
    w3row = small[4:5, :h2]
    b3 = small[5:6, 0:1]

    # fc1
    x = jnp.dot(state, w1_ref[...], preferred_element_type=jnp.float32) + b1

    # BatchNorm1d (training mode: batch mean, biased variance, eps=1e-5),
    # affine fused into the normalization, relu folded in.
    mean = jnp.mean(x, axis=0, keepdims=True)
    var = jnp.mean((x - mean) * (x - mean), axis=0, keepdims=True)
    scale = gamma * jax.lax.rsqrt(var + 1e-5)     # rsqrt -> EUP slot
    shift = beta - mean * scale
    x = jnp.maximum(x * scale + shift, 0.0)

    # relu(cat(x, action)): x is already >= 0, so relu only affects the action part.
    a = jnp.maximum(action, 0.0)

    # fc2 on the (virtual) concatenation, using in-kernel slices of one W2 matrix.
    w2 = w2_ref[...]                       # (h1 + actions_dim, h2)
    mu = (jnp.dot(x, w2[:h1, :], preferred_element_type=jnp.float32)
          + jnp.dot(a, w2[h1:, :], preferred_element_type=jnp.float32)
          + b2)
    mu = jnp.maximum(mu, 0.0)

    # fc3 (N=1): VPU multiply + XLU lane reduction instead of a masked MXU matmul.
    q = jnp.sum(mu * w3row, axis=-1, keepdims=True) + b3
    out_ref[...] = jnp.maximum(q, 0.0)


def ddpg_critic_forward(state, action, params):
    B, state_dim = state.shape
    actions_dim = action.shape[1]
    h1 = params["w1"].shape[1]
    h2 = params["w2x"].shape[1]

    # Pack inputs: one (B, S+A) activation slab, one fused fc2 weight matrix,
    # one (8, 128) slab holding every small vector parameter.
    sa = jnp.concatenate([state, action], axis=1)
    w2 = jnp.concatenate([params["w2x"], params["w2a"]], axis=0)

    small = jnp.zeros((8, 128), jnp.float32)
    small = small.at[0, :h1].set(params["b1"][0])
    small = small.at[1, :h1].set(params["gamma"][0])
    small = small.at[2, :h1].set(params["beta"][0])
    small = small.at[3, :h2].set(params["b2"][0])
    small = small.at[4, :h2].set(params["w3"][:, 0])
    small = small.at[5, 0].set(params["b3"][0, 0])

    kernel = functools.partial(critic_kernel, state_dim=state_dim, h1=h1, h2=h2)
    vmem = pl.BlockSpec(memory_space=pltpu.MemorySpace.VMEM)
    return pl.pallas_call(
        kernel,
        out_shape=jax.ShapeDtypeStruct((B, 1), jnp.float32),
        in_specs=[vmem, vmem, vmem, vmem],
        out_specs=vmem,
    )(sa, params["w1"], w2, small)
    # TODO(synk): for large replay batches (B >= 256), switch to a batch-gridded,
    # two-pass BatchNorm variant (stats kernel + normalize kernel) with
    # dimension_semantics=("parallel",) so megacore TPUs shard the batch.


def init_params(key, state_dim, actions_dim, hidden_units):
    h1, h2 = hidden_units
    ks = jax.random.split(key, 8)

    # fc1: uniform(-1/sqrt(h1), 1/sqrt(h1))  (module's hidden_init uses weight.size()[0])
    lim1 = 1.0 / math.sqrt(h1)
    w1 = jax.random.uniform(ks[0], (state_dim, h1), jnp.float32, -lim1, lim1)
    b1 = jax.random.uniform(ks[1], (1, h1), jnp.float32, -lim1, lim1)

    # BatchNorm1d affine params (PyTorch default init)
    gamma = jnp.ones((1, h1), jnp.float32)
    beta = jnp.zeros((1, h1), jnp.float32)

    # fc2: uniform(-1/sqrt(h2), 1/sqrt(h2)); input dim = h1 + actions_dim (split)
    lim2 = 1.0 / math.sqrt(h2)
    w2x = jax.random.uniform(ks[2], (h1, h2), jnp.float32, -lim2, lim2)
    w2a = jax.random.uniform(ks[3], (actions_dim, h2), jnp.float32, -lim2, lim2)
    b2 = jax.random.uniform(ks[4], (1, h2), jnp.float32, -lim2, lim2)

    # fc3: uniform(-0.003, 0.003)
    w3 = jax.random.uniform(ks[5], (h2, 1), jnp.float32, -0.003, 0.003)
    b3 = jax.random.uniform(ks[6], (1, 1), jnp.float32, -0.003, 0.003)

    return dict(w1=w1, b1=b1, gamma=gamma, beta=beta,
                w2x=w2x, w2a=w2a, b2=b2, w3=w3, b3=b3)


if __name__ == "__main__":
    # Small shapes consistent with the module: batch=8, state_dim=16,
    # actions_dim=4, hidden_units=(32, 16).
    B, STATE_DIM, ACTIONS_DIM = 8, 16, 4
    HIDDEN = (32, 16)

    key = jax.random.PRNGKey(0)
    k_state, k_action, k_params = jax.random.split(key, 3)

    state = jax.random.normal(k_state, (B, STATE_DIM), jnp.float32)
    action = jax.random.normal(k_action, (B, ACTIONS_DIM), jnp.float32)
    params = init_params(k_params, STATE_DIM, ACTIONS_DIM, HIDDEN)

    out = ddpg_critic_forward(state, action, params)
    jax.block_until_ready(out)

    # Reference check in plain JAX (same math as the PyTorch module in train mode).
    def ref(state, action, p):
        x = state @ p["w1"] + p["b1"]
        m = x.mean(axis=0, keepdims=True)
        v = ((x - m) ** 2).mean(axis=0, keepdims=True)
        x = (x - m) / jnp.sqrt(v + 1e-5) * p["gamma"] + p["beta"]
        x = jnp.maximum(x, 0.0)
        mu = jnp.concatenate([x, action], axis=1)
        mu = jnp.maximum(mu, 0.0)
        w2 = jnp.concatenate([p["w2x"], p["w2a"]], axis=0)
        mu = jnp.maximum(mu @ w2 + p["b2"], 0.0)
        mu = jnp.maximum(mu @ p["w3"] + p["b3"], 0.0)
        return mu

    ref_out = ref(state, action, params)
    assert out.shape == (B, 1)
    assert jnp.allclose(out, ref_out, atol=1e-4, rtol=1e-4)

    print("KERNEL_OK")
</pallas_src>

<mosaic_0001>
module attributes {stable_mosaic.version = 11 : i64} {
  func.func @critic_kernel(%arg0: memref<8x20xf32, #tpu.memory_space<vmem>>, %arg1: memref<16x32xf32, #tpu.memory_space<vmem>>, %arg2: memref<36x16xf32, #tpu.memory_space<vmem>>, %arg3: memref<8x128xf32, #tpu.memory_space<vmem>>, %arg4: memref<8x1xf32, #tpu.memory_space<vmem>>) attributes {dimension_semantics = [], scalar_prefetch = 0 : i64, scratch_operands = 0 : i64, tpu.core_type = #tpu.core_type<tc>} {
    %c0 = arith.constant 0 : index
    %c0_0 = arith.constant 0 : index
    %0 = vector.load %arg0[%c0, %c0_0] : memref<8x20xf32, #tpu.memory_space<vmem>>, vector<8x20xf32>
    %1 = vector.extract_strided_slice %0 {offsets = [0, 0], sizes = [8, 16], strides = [1, 1]} : vector<8x20xf32> to vector<8x16xf32>
    %2 = vector.extract_strided_slice %0 {offsets = [0, 16], sizes = [8, 4], strides = [1, 1]} : vector<8x20xf32> to vector<8x4xf32>
    %c0_1 = arith.constant 0 : index
    %c0_2 = arith.constant 0 : index
    %3 = vector.load %arg3[%c0_1, %c0_2] : memref<8x128xf32, #tpu.memory_space<vmem>>, vector<8x128xf32>
    %4 = vector.extract_strided_slice %3 {offsets = [0, 0], sizes = [1, 32], strides = [1, 1]} : vector<8x128xf32> to vector<1x32xf32>
    %5 = vector.extract_strided_slice %3 {offsets = [1, 0], sizes = [1, 32], strides = [1, 1]} : vector<8x128xf32> to vector<1x32xf32>
    %6 = vector.extract_strided_slice %3 {offsets = [2, 0], sizes = [1, 32], strides = [1, 1]} : vector<8x128xf32> to vector<1x32xf32>
    %7 = vector.extract_strided_slice %3 {offsets = [3, 0], sizes = [1, 16], strides = [1, 1]} : vector<8x128xf32> to vector<1x16xf32>
    %8 = vector.extract_strided_slice %3 {offsets = [4, 0], sizes = [1, 16], strides = [1, 1]} : vector<8x128xf32> to vector<1x16xf32>
    %9 = vector.extract_strided_slice %3 {offsets = [5, 0], sizes = [1, 1], strides = [1, 1]} : vector<8x128xf32> to vector<1x1xf32>
    %c0_3 = arith.constant 0 : index
    %c0_4 = arith.constant 0 : index
    %10 = vector.load %arg1[%c0_3, %c0_4] : memref<16x32xf32, #tpu.memory_space<vmem>>, vector<16x32xf32>
    %cst = arith.constant dense<0.000000e+00> : vector<8x32xf32>
    %11 = tpu.matmul %1, %10, %cst {dimension_numbers = #tpu.dot_dimension_numbers<[1], [0], [0], [1], [0, 0, 1, 1], [], []>} : vector<8x16xf32>, vector<16x32xf32>, vector<8x32xf32> -> vector<8x32xf32>
    %12 = vector.broadcast %4 : vector<1x32xf32> to vector<8x32xf32>
    %13 = arith.addf %11, %12 : vector<8x32xf32>
    %cst_5 = arith.constant dense<0.000000e+00> : vector<32xf32>
    %14 = vector.multi_reduction <add>, %13, %cst_5 [0] : vector<8x32xf32> to vector<32xf32>
    %15 = vector.shape_cast %14 : vector<32xf32> to vector<1x32xf32>
    %cst_6 = arith.constant 8.000000e+00 : f32
    %16 = vector.broadcast %cst_6 : f32 to vector<1x32xf32>
    %17 = arith.divf %15, %16 : vector<1x32xf32>
    %18 = vector.broadcast %17 : vector<1x32xf32> to vector<8x32xf32>
    %19 = arith.subf %13, %18 : vector<8x32xf32>
    %20 = vector.broadcast %17 : vector<1x32xf32> to vector<8x32xf32>
    %21 = arith.subf %13, %20 : vector<8x32xf32>
    %22 = arith.mulf %19, %21 : vector<8x32xf32>
    %cst_7 = arith.constant dense<0.000000e+00> : vector<32xf32>
    %23 = vector.multi_reduction <add>, %22, %cst_7 [0] : vector<8x32xf32> to vector<32xf32>
    %24 = vector.shape_cast %23 : vector<32xf32> to vector<1x32xf32>
    %cst_8 = arith.constant 8.000000e+00 : f32
    %25 = vector.broadcast %cst_8 : f32 to vector<1x32xf32>
    %26 = arith.divf %24, %25 : vector<1x32xf32>
    %cst_9 = arith.constant 9.99999974E-6 : f32
    %27 = vector.broadcast %cst_9 : f32 to vector<1x32xf32>
    %28 = arith.addf %26, %27 : vector<1x32xf32>
    %29 = math.rsqrt %28 : vector<1x32xf32>
    %30 = arith.mulf %5, %29 : vector<1x32xf32>
    %31 = arith.mulf %17, %30 : vector<1x32xf32>
    %32 = arith.subf %6, %31 : vector<1x32xf32>
    %33 = vector.broadcast %30 : vector<1x32xf32> to vector<8x32xf32>
    %34 = arith.mulf %13, %33 : vector<8x32xf32>
    %35 = vector.broadcast %32 : vector<1x32xf32> to vector<8x32xf32>
    %36 = arith.addf %34, %35 : vector<8x32xf32>
    %cst_10 = arith.constant 0.000000e+00 : f32
    %37 = vector.broadcast %cst_10 : f32 to vector<8x32xf32>
    %38 = arith.maximumf %36, %37 : vector<8x32xf32>
    %cst_11 = arith.constant 0.000000e+00 : f32
    %39 = vector.broadcast %cst_11 : f32 to vector<8x4xf32>
    %40 = arith.maximumf %2, %39 : vector<8x4xf32>
    %c0_12 = arith.constant 0 : index
    %c0_13 = arith.constant 0 : index
    %41 = vector.load %arg2[%c0_12, %c0_13] : memref<36x16xf32, #tpu.memory_space<vmem>>, vector<36x16xf32>
    %42 = vector.extract_strided_slice %41 {offsets = [0, 0], sizes = [32, 16], strides = [1, 1]} : vector<36x16xf32> to vector<32x16xf32>
    %cst_14 = arith.constant dense<0.000000e+00> : vector<8x16xf32>
    %43 = tpu.matmul %38, %42, %cst_14 {dimension_numbers = #tpu.dot_dimension_numbers<[1], [0], [0], [1], [0, 0, 1, 1], [], []>} : vector<8x32xf32>, vector<32x16xf32>, vector<8x16xf32> -> vector<8x16xf32>
    %44 = vector.extract_strided_slice %41 {offsets = [32, 0], sizes = [4, 16], strides = [1, 1]} : vector<36x16xf32> to vector<4x16xf32>
    %cst_15 = arith.constant dense<0.000000e+00> : vector<8x16xf32>
    %45 = tpu.matmul %40, %44, %cst_15 {dimension_numbers = #tpu.dot_dimension_numbers<[1], [0], [0], [1], [0, 0, 1, 1], [], []>} : vector<8x4xf32>, vector<4x16xf32>, vector<8x16xf32> -> vector<8x16xf32>
    %46 = arith.addf %43, %45 : vector<8x16xf32>
    %47 = vector.broadcast %7 : vector<1x16xf32> to vector<8x16xf32>
    %48 = arith.addf %46, %47 : vector<8x16xf32>
    %cst_16 = arith.constant 0.000000e+00 : f32
    %49 = vector.broadcast %cst_16 : f32 to vector<8x16xf32>
    %50 = arith.maximumf %48, %49 : vector<8x16xf32>
    %51 = vector.broadcast %8 : vector<1x16xf32> to vector<8x16xf32>
    %52 = arith.mulf %50, %51 : vector<8x16xf32>
    %cst_17 = arith.constant dense<0.000000e+00> : vector<8xf32>
    %53 = vector.multi_reduction <add>, %52, %cst_17 [1] : vector<8x16xf32> to vector<8xf32>
    %54 = vector.shape_cast %53 : vector<8xf32> to vector<8x1xf32>
    %55 = vector.broadcast %9 : vector<1x1xf32> to vector<8x1xf32>
    %56 = arith.addf %54, %55 : vector<8x1xf32>
    %cst_18 = arith.constant 0.000000e+00 : f32
    %57 = vector.broadcast %cst_18 : f32 to vector<8x1xf32>
    %58 = arith.maximumf %56, %57 : vector<8x1xf32>
    %c0_19 = arith.constant 0 : index
    %c0_20 = arith.constant 0 : index
    %59 = vector.load %arg4[%c0_19, %c0_20] : memref<8x1xf32, #tpu.memory_space<vmem>>, vector<8x1xf32>
    tpu.vector_store %arg4[%c0_19, %c0_20], %58 {strides = array<i32>} : memref<8x1xf32, #tpu.memory_space<vmem>>, vector<8x1xf32>,
    return
  }
}

</mosaic_0001>

<bundles_post_ra>
// kernel: tpu_custom_call.1
= control target key start
LH: loop header
LB: loop body
LE: loop exit
PB: predicated region body
PF: predicated region fallthrough
CT: control target
= control target key end

     0   :  { %v375_v0 = vmov 0.0|0.0   ;;  %vm376_vm0 = vmmov 0   ;;  %v377_v3 = vmov 0.0   ;;  %vm25_vm1 = vcmask 130048   ;;  %s378_s21 = smov 112   ;;  %s439_s1 = inlined_call_operand.vmem [shape: f32[16,32], index: 1, kind: input, shape index: {}]   ;;  %s440_s0 = inlined_call_operand.vmem [shape: f32[8,20], index: 0, kind: input, shape index: {}]   ;;  %s441_s2 = inlined_call_operand.vmem [shape: f32[36,16], index: 2, kind: input, shape index: {}]   ;;  %s442_s3 = inlined_call_operand.vmem [shape: f32[8,128], index: 3, kind: input, shape index: {}]   ;;  %s443_s4 = inlined_call_operand.vmem [shape: f32[8,1], index: 4, kind: output, shape index: {}]  }
   0x1   :  { %360 = vmatprep.subr.bf16.mxu0 %v375_v0  ;;  %v19_v1 = vld [vmem:[%s439_s1] sm:$0xff]  ;;  %v20_v2 = vld [vmem:[%s439_s1 + $0x8] sm:$0xff]  ;;  %341 = vmatprep.mubr.msk.f32.mxu0 %vm376_vm0, %v377_v3  ;;  %vm150_vm2 = vcmask 1043456   ;;  %v141_v11 = vld [vmem:[%s441_s2 + $0x10] sm:$0xff]  ;;  %vm147_vm3 = vcmask 31744   ;;  %v21_v15 = vlaneseq  ;;  %vm99_vm4 = vcmask 261120  }
   0x2   :  { %v17_v4 = vld [vmem:[%s440_s0] sm:$0xff]  ;;  %v361_v5 = vpack.c.bf16 %v20_v2, %v19_v1  ;;  %363 = vmatprep.subr.bf16.mxu1 %v375_v0  ;;  %357 = vmatprep.mubr.msk.f32.mxu1 %vm376_vm0, %v377_v3  ;;  %v140_v8 = vld [vmem:[%s441_s2 + $0x8] sm:$0xff]  ;;  %v142_v12 = vld [vmem:[%s441_s2 + $0x18] sm:$0xff]  ;;  %vm317_vm5 = vcmask 7168  }
   0x3   :  { %v138_v6 = vmax.f32 %v17_v4, 0.0  ;;  %v139_v7 = vld [vmem:[%s441_s2] sm:$0xff]  ;;  %v367_v13 = vpack.c.bf16 %v142_v12, %v141_v11  ;;  %v22_v16 = vshrl.u32 %v21_v15, 7 }
   0x4   :  { %362 = vmatpush3.bf16.msra.mxu0 %v361_v5  ;;  %v143_v9 = vld [vmem:[%s441_s2 + $0x20] sm:$0xf]  ;;  %v364_v10 = vpack.c.bf16 %v140_v8, %v139_v7 }
   0x5   :  { %145 = vrot.lane.b32.xlu0 %v138_v6, %s378_s21  ;;  %344 = vmatprep.subr.mxu0 %v377_v3  ;;  %v23_v17 = vsub.s32 0, %v22_v16  ;;  %v18_v18 = vld [vmem:[%s442_s3] sm:$0xff]  ;;  %v129_v44 = vsub.s32 1, %v22_v16  ;;  %v134_v48 = vsub.s32 2, %v22_v16  ;;  %v299_v56 = vsub.s32 3, %v22_v16 }
   0x6   :  { %365 = vmatpush3.bf16.msra.mxu1 %v364_v10  ;;  %v305_v58 = vsub.s32 4, %v22_v16 }
   0x7   :  { %342 = vmatmul.mubr.msk.f32.vlgmr.msra.gmra.mrb[0].mxu0 %vm25_vm1, %v17_v4  ;;  %366 = vmatprep.subr.bf16.mxu1 %v375_v0  ;;  %v24_v19 = vrot.slane %v18_v18, %v23_v17  ;;  %v300_v57 = vrot.slane %v18_v18, %v299_v56 }
   0x8   :  { %346 = vmatprep.mubr.msk.f32.mxu0 %vm376_vm0, %v377_v3  ;;  %345 = vmatpush3.msk.msra.mxu0 %vm150_vm2, %v143_v9  ;;  %v306_v63 = vrot.slane %v18_v18, %v305_v58  ;;  %v313_v3 = vsub.s32 5, %v22_v16 }
   0xa   :  { %368 = vmatpush3.bf16.msra.mxu1 %v367_v13  ;;  %v314_v4 = vrot.slane %v18_v18, %v313_v3 }
  0x77   :  { %v146_v14 = vpop.permute.xlu0 %145 }
  0x78   :  { %347 = vmatmul.mubr.msk.f32.vlgmr.msra.gmra.mrb[2].mxu0 %vm147_vm3, %v146_v14 }
  0xda   :  { %v95_v20 = vpop.f32.mrb[0].mxu0 }
  0xdb   :  { %v96_v21 = vadd.f32 %v95_v20, %v24_v19  ;;  %v343_v22 = vpop.f32.mrb[1].mxu0 }
  0xdd   :  { %v100_v23 = vsel %vm99_vm4, %v96_v21, 0.0 }
  0xde   :  { %v101_v24 = vrot.slane %v100_v23, 4 }
  0xe0   :  { %v102_v25 = vadd.f32 %v101_v24, %v100_v23 }
  0xe2   :  { %v103_v26 = vrot.slane %v102_v25, 2 }
  0xe4   :  { %v104_v27 = vadd.f32 %v103_v26, %v102_v25 }
  0xe6   :  { %v105_v28 = vrot.slane %v104_v27, 1 }
  0xe8   :  { %v106_v29 = vadd.f32 %v105_v28, %v104_v27 }
  0xea   :  { %v108_v30 = vmul.f32 0.125, %v106_v29 }
  0xec   :  { %v109_v31 = vsub.f32 %v96_v21, %v108_v30 }
  0xee   :  { %v110_v32 = vmul.f32 %v109_v31, %v109_v31 }
  0xf0   :  { %v111_v33 = vsel %vm99_vm4, %v110_v32, 0.0 }
  0xf1   :  { %v112_v34 = vrot.slane %v111_v33, 4 }
  0xf3   :  { %v113_v35 = vadd.f32 %v112_v34, %v111_v33 }
  0xf5   :  { %v114_v36 = vrot.slane %v113_v35, 2 }
  0xf7   :  { %v115_v37 = vadd.f32 %v114_v36, %v113_v35 }
  0xf9   :  { %v116_v38 = vrot.slane %v115_v37, 1 }
  0xfb   :  { %v117_v39 = vadd.f32 %v116_v38, %v115_v37 }
  0xfd   :  { %v118_v40 = vmul.f32 0.125, %v117_v39 }
  0xff   :  { %v119_v41 = vadd.f32 1e-05, %v118_v40 }
 0x101   :  { %373 = vrsqrt.f32 %v119_v41 }
 0x10b   :  { %v374_v42 = vpop.eup %373 }
 0x10c   :  { %v121_v43 = vmul.f32 %v374_v42, %v18_v18 }
 0x10e   :  { %v122_v45 = vmul.f32 %v121_v43, %v108_v30  ;;  %v130_v47 = vrot.slane %v121_v43, %v129_v44 }
 0x110   :  { %v124_v46 = vrot.slane %v122_v45, 7  ;;  %v131_v50 = vmul.f32 %v130_v47, %v96_v21 }
 0x112   :  { %v126_v49 = vsub.f32 %v18_v18, %v124_v46 }
 0x114   :  { %v135_v51 = vrot.slane %v126_v49, %v134_v48 }
 0x116   :  { %v136_v52 = vadd.f32 %v135_v51, %v131_v50 }
 0x118   :  { %v137_v53 = vmax.f32 %v136_v52, 0.0 }
 0x11a   :  { %358 = vmatmul.mubr.msk.f32.vlgmr.msra.gmra.mrb[0].mxu1 %vm99_vm4, %v137_v53 }
 0x14b   :  { %v220_v54 = vpop.f32.mrb[2].mxu0 }
 0x14c   :  { %v348_v55 = vpop.f32.mrb[3].mxu0 }
 0x1ed   :  { %v293_v59 = vpop.f32.mrb[0].mxu1 }
 0x1ee   :  { %v294_v60 = vadd.f32 %v293_v59, %v220_v54  ;;  %v359_v61 = vpop.f32.mrb[1].mxu1 }
 0x1f0   :  { %v301_v62 = vadd.f32 %v300_v57, %v294_v60 }
 0x1f2   :  { %v302_v0 = vmax.f32 %v301_v62, 0.0 }
 0x1f4   :  { %v307_v1 = vmul.f32 %v306_v63, %v302_v0 }
 0x1f6   :  { %v308_v2 = vsel %vm25_vm1, %v307_v1, 0.0 }
 0x1f7   :  { %309 = vadd.xlane.f32.xlu0 %v308_v2 }
 0x284   :  { %v310_v5 = vpop.xlane.xlu0 %309 }
 0x285   :  { %v315_v6 = vadd.f32 %v314_v4, %v310_v5 }
 0x287   :  { %v316_v7 = vmax.f32 %v315_v6, 0.0 }
 0x289   :  { %318 = vst.msk [vmem:[%s443_s4] sm:$0xff] %vm317_vm5, %v316_v7 }

</bundles_post_ra>
